<compile_context>
chip_gen: v5e
topology: v5e:2x2
jax: 0.10.0
libtpu: 0.0.40
codegen_flags: <defaults>
</compile_context>

<pallas_src>
import functools

import jax
import jax.numpy as jnp
from jax.experimental import pallas as pl
from jax.experimental.pallas import tpu as pltpu


# ----------------------------- kernels ------------------------------------ #

def _layer_norm_epilogue(y, gamma, beta, eps):
    """y: (tm, H) f32.  Two-pass LayerNorm + fused scale/shift."""
    inv_h = 1.0 / y.shape[-1]
    mean = jnp.sum(y, axis=-1, keepdims=True) * inv_h
    d = y - mean
    var = jnp.sum(d * d, axis=-1, keepdims=True) * inv_h
    scale = gamma * jax.lax.rsqrt(var + eps)          # broadcasts to (tm, H)
    return d * scale + beta


def _former_output_resident_kernel(h_ref, res_ref, wt_ref, p_ref, o_ref, *, eps):
    """Weight fully VMEM-resident: one MXU matmul + LN per row tile."""
    # In-kernel cast to the matmul dtype (no wrapper-side HBM pass).
    h = h_ref[...].astype(wt_ref.dtype)
    y = jnp.dot(h, wt_ref[...], preferred_element_type=jnp.float32)   # (tm, H) f32

    p = p_ref[...].astype(jnp.float32)                 # (3, H): bias / gamma / beta
    bias, gamma, beta = p[0:1, :], p[1:2, :], p[2:3, :]

    # TODO(synk): dropout is identity in eval mode; no RNG mask applied here.
    y = y + bias + res_ref[...].astype(jnp.float32)
    o_ref[...] = _layer_norm_epilogue(y, gamma, beta, eps).astype(o_ref.dtype)


def _former_output_ktiled_kernel(h_ref, res_ref, wt_ref, p_ref, o_ref, acc_ref, *, eps):
    """Fallback for weights too large for VMEM: K-tiled reduction + f32 acc."""
    k = pl.program_id(1)

    @pl.when(k == 0)
    def _init():
        acc_ref[...] = jnp.zeros_like(acc_ref)

    acc_ref[...] += jnp.dot(h_ref[...].astype(wt_ref.dtype), wt_ref[...],
                            preferred_element_type=jnp.float32)

    @pl.when(k == pl.num_programs(1) - 1)
    def _finalize():
        p = p_ref[...].astype(jnp.float32)
        bias, gamma, beta = p[0:1, :], p[1:2, :], p[2:3, :]
        # TODO(synk): dropout is identity in eval mode; no RNG mask applied here.
        y = acc_ref[...] + bias + res_ref[...].astype(jnp.float32)
        o_ref[...] = _layer_norm_epilogue(y, gamma, beta, eps).astype(o_ref.dtype)


# ----------------------------- wrapper ------------------------------------ #

def _round_up(x, m):
    return ((x + m - 1) // m) * m


def _vmem_capacity_bytes():
    try:
        return int(pltpu.get_tpu_info().vmem_capacity_bytes)
    except Exception:
        return None


def prepare_former_output_params(w, b, gamma, beta, *, matmul_dtype=jnp.bfloat16):
    """Call-invariant preprocessing — run ONCE outside the hot path.

    w: (H, I) PyTorch Linear weight.  Returns:
      wt:     (I, H) weight, transposed and cast to the matmul dtype,
      params: (3, H) f32 array packing [bias, LN gamma, LN beta].
    """
    wt = jnp.asarray(w).T.astype(matmul_dtype)                      # (I, H)
    params = jnp.stack([jnp.asarray(b), jnp.asarray(gamma),
                        jnp.asarray(beta)]).astype(jnp.float32)     # (3, H)
    return wt, params


def former_output(hidden_states, input_tensor, wt, params, *, eps=1e-12,
                  tm=None, tk=1024, weight_resident=None,
                  vmem_limit_bytes=None):
    """hidden_states: (..., I), input_tensor: (..., H).
    wt: (I, H) pre-transposed weight (see prepare_former_output_params),
    params: (3, H) packed [bias, gamma, beta]."""
    orig_shape = input_tensor.shape
    I, H = wt.shape

    # reshape is metadata-only for contiguous inputs (no HBM pass).
    h2 = hidden_states.reshape(-1, I)
    r2 = input_tensor.reshape(-1, H)
    M = h2.shape[0]
    out_dtype = input_tensor.dtype

    # --- Scoped-VMEM budget (generation aware; explicit override supported) ---
    cap = _vmem_capacity_bytes()
    if vmem_limit_bytes is None:
        if cap is not None:
            # ~3/4 of physical: v5e/v6e 128 MiB -> 96 MiB, v7x 64 MiB -> 48 MiB.
            vmem_limit_bytes = int(min(cap * 3 // 4, 96 * 1024 * 1024))
        else:
            # Chip query unavailable: conservative 64 MiB.  NOTE: on 128-MiB
            # parts pass vmem_limit_bytes explicitly to unlock bigger tiles.
            vmem_limit_bytes = 64 * 1024 * 1024
    budget = int(vmem_limit_bytes) * 3 // 4      # headroom for compiler temps

    # 64-MiB-VMEM parts (v7x-class) also have 2 TensorCores per chip.
    small_vmem = cap is not None and cap <= 64 * 1024 * 1024

    w_bytes = I * H * wt.dtype.itemsize
    if weight_resident is None:
        # Resident whenever the (double-buffered) weight leaves >= half the
        # budget for activation / residual / output tiles.
        resident = 2 * w_bytes <= budget // 2
    else:
        resident = bool(weight_resident)

    if resident:
        tk_eff = I
        n_k = 1
    else:
        tk_eff = I
        for cand in (tk, 2048, 1024, 512, 256, 128):
            if cand and cand <= I and I % cand == 0 and cand % 128 == 0:
                tk_eff = cand
                break
        n_k = I // tk_eff

    def fits(rows):
        act = 2 * rows * tk_eff * h2.dtype.itemsize
        res = 2 * rows * H * r2.dtype.itemsize
        out = 2 * rows * H * jnp.dtype(out_dtype).itemsize
        tmp = 3 * rows * H * 4                                   # f32 LN / acc temps
        wgt = 2 * (w_bytes if resident else tk_eff * H * wt.dtype.itemsize)
        prm = 2 * 3 * H * 4
        return act + res + out + tmp + wgt + prm <= budget

    if tm is None:
        tm = 512 if small_vmem else 1024
    tm_eff = max(8, min(_round_up(tm, 8), _round_up(M, 8)))
    if small_vmem and M > 8:
        # Keep n_m >= 2 so the "parallel" row axis shards across both v7x cores.
        tm_eff = min(tm_eff, max(8, _round_up(-(-M // 2), 8)))
    while tm_eff > 8 and not fits(tm_eff):
        tm_eff = max(8, _round_up(tm_eff // 2, 8))

    # Ragged last row tile: reads past M are garbage in dropped rows only,
    # writes past M are masked — no wrapper-side padding needed.
    n_m = pl.cdiv(M, tm_eff)

    out_shape = jax.ShapeDtypeStruct((M, H), out_dtype)
    compiler_params = pltpu.CompilerParams(
        dimension_semantics=("parallel",) if resident else ("parallel", "arbitrary"),
        vmem_limit_bytes=int(vmem_limit_bytes),
    )

    if resident:
        out = pl.pallas_call(
            functools.partial(_former_output_resident_kernel, eps=eps),
            out_shape=out_shape,
            grid_spec=pltpu.PrefetchScalarGridSpec(
                num_scalar_prefetch=0,
                grid=(n_m,),
                in_specs=[
                    pl.BlockSpec((tm_eff, I), lambda i: (i, 0)),   # activations
                    pl.BlockSpec((tm_eff, H), lambda i: (i, 0)),   # residual rows
                    pl.BlockSpec((I, H), lambda i: (0, 0)),        # resident W^T
                    pl.BlockSpec((3, H), lambda i: (0, 0)),        # bias/gamma/beta
                ],
                out_specs=pl.BlockSpec((tm_eff, H), lambda i: (i, 0)),
            ),
            compiler_params=compiler_params,
        )(h2, r2, wt, params)
    else:
        out = pl.pallas_call(
            functools.partial(_former_output_ktiled_kernel, eps=eps),
            out_shape=out_shape,
            grid_spec=pltpu.PrefetchScalarGridSpec(
                num_scalar_prefetch=0,
                grid=(n_m, n_k),
                in_specs=[
                    pl.BlockSpec((tm_eff, tk_eff), lambda i, k: (i, k)),  # activations
                    pl.BlockSpec((tm_eff, H), lambda i, k: (i, 0)),       # residual
                    pl.BlockSpec((tk_eff, H), lambda i, k: (k, 0)),       # W^T K-slab
                    pl.BlockSpec((3, H), lambda i, k: (0, 0)),            # bias/gamma/beta
                ],
                out_specs=pl.BlockSpec((tm_eff, H), lambda i, k: (i, 0)),
                scratch_shapes=[pltpu.VMEM((tm_eff, H), jnp.float32)],    # f32 acc
            ),
            compiler_params=compiler_params,
        )(h2, r2, wt, params)

    return out.reshape(orig_shape)


# ----------------------------- reference / test ---------------------------- #

def _reference(hidden_states, input_tensor, w, b, gamma, beta, eps=1e-12):
    y = jnp.einsum("...i,hi->...h", hidden_states, w) + b
    y = y + input_tensor
    mean = jnp.mean(y, axis=-1, keepdims=True)
    var = jnp.mean((y - mean) ** 2, axis=-1, keepdims=True)
    return (y - mean) * jax.lax.rsqrt(var + eps) * gamma + beta


if __name__ == "__main__":
    # Small config: batch=2, seq=8, hidden_size=32, intermediate_size=64.
    B, S, H, I = 2, 8, 32, 64
    eps = 1e-12

    key = jax.random.PRNGKey(0)
    k_h, k_r, k_w, k_b = jax.random.split(key, 4)

    hidden_states = jax.random.normal(k_h, (B, S, I), dtype=jnp.float32)
    input_tensor = jax.random.normal(k_r, (B, S, H), dtype=jnp.float32)

    # Deterministic synthetic parameters (no checkpoint load).
    w = jax.random.normal(k_w, (H, I), dtype=jnp.float32) * 0.02   # Linear weight
    b = jax.random.normal(k_b, (H,), dtype=jnp.float32) * 0.02     # Linear bias
    gamma = jnp.ones((H,), dtype=jnp.float32)                      # LN weight
    beta = jnp.zeros((H,), dtype=jnp.float32)                      # LN bias

    ref = _reference(hidden_states, input_tensor, w, b, gamma, beta, eps=eps)

    # 1) Exactness check: f32 matmul, resident-weight path.
    wt32, params32 = prepare_former_output_params(
        w, b, gamma, beta, matmul_dtype=jnp.float32)
    out32 = jax.block_until_ready(
        former_output(hidden_states, input_tensor, wt32, params32, eps=eps))
    assert out32.shape == (B, S, H)
    assert jnp.allclose(out32, ref, atol=1e-5, rtol=1e-5), "f32 mismatch vs reference"

    # 2) Fast path: bf16 weight, in-kernel activation cast, f32 MXU acc + f32 LN.
    wt16, params16 = prepare_former_output_params(
        w, b, gamma, beta, matmul_dtype=jnp.bfloat16)
    out16 = jax.block_until_ready(
        former_output(hidden_states, input_tensor, wt16, params16, eps=eps))
    assert out16.shape == (B, S, H)
    assert jnp.allclose(out16.astype(jnp.float32), ref, atol=3e-2, rtol=3e-2), \
        "bf16 mismatch vs reference"

    # 3) Ragged row count (M = 3*5 = 15): exercises the pl.cdiv grid with a
    #    boundary row tile and masked writeback (no wrapper-side padding).
    hs_r = jax.random.normal(k_h, (3, 5, I), dtype=jnp.float32)
    in_r = jax.random.normal(k_r, (3, 5, H), dtype=jnp.float32)
    ref_r = _reference(hs_r, in_r, w, b, gamma, beta, eps=eps)
    out_r = jax.block_until_ready(
        former_output(hs_r, in_r, wt32, params32, eps=eps))
    assert out_r.shape == (3, 5, H)
    assert jnp.allclose(out_r, ref_r, atol=1e-5, rtol=1e-5), "ragged-M mismatch"

    # 4) K-tiled fallback path (forced, with I2=256 so there are 2 K steps).
    I2 = 256
    k_h2, k_w2 = jax.random.split(k_h)
    hs2 = jax.random.normal(k_h2, (B, S, I2), dtype=jnp.float32)
    w2 = jax.random.normal(k_w2, (H, I2), dtype=jnp.float32) * 0.02
    ref2 = _reference(hs2, input_tensor, w2, b, gamma, beta, eps=eps)
    wt2, params2 = prepare_former_output_params(
        w2, b, gamma, beta, matmul_dtype=jnp.float32)
    out_kt = jax.block_until_ready(
        former_output(hs2, input_tensor, wt2, params2, eps=eps,
                      weight_resident=False, tk=128))
    assert out_kt.shape == (B, S, H)
    assert jnp.allclose(out_kt, ref2, atol=1e-5, rtol=1e-5), "K-tiled mismatch"

    print("KERNEL_OK")
</pallas_src>

<mosaic_0001>
module attributes {stable_mosaic.version = 11 : i64} {
  func.func @_former_output_resident_kernel(%arg0: i32, %arg1: memref<16x64xf32, #tpu.memory_space<vmem>>, %arg2: memref<16x32xf32, #tpu.memory_space<vmem>>, %arg3: memref<64x32xf32, #tpu.memory_space<vmem>>, %arg4: memref<3x32xf32, #tpu.memory_space<vmem>>, %arg5: memref<16x32xf32, #tpu.memory_space<vmem>>) attributes {dimension_semantics = [#tpu.dimension_semantics<parallel>], iteration_bounds = array<i64: 1>, scalar_prefetch = 0 : i64, scratch_operands = 0 : i64, tpu.core_type = #tpu.core_type<tc>, window_params = [{transform_indices = @transform_0, window_bounds = array<i64: 16, 64>}, {transform_indices = @transform_1, window_bounds = array<i64: 16, 32>}, {pipeline_mode = #tpu.pipeline_mode<synchronous>, transform_indices = @transform_2, window_bounds = array<i64: 64, 32>}, {pipeline_mode = #tpu.pipeline_mode<synchronous>, transform_indices = @transform_3, window_bounds = array<i64: 3, 32>}, {transform_indices = @transform_4, window_bounds = array<i64: 16, 32>}]} {
    %c0 = arith.constant 0 : index
    %c0_0 = arith.constant 0 : index
    %0 = vector.load %arg1[%c0, %c0_0] : memref<16x64xf32, #tpu.memory_space<vmem>>, vector<16x64xf32>
    %c0_1 = arith.constant 0 : index
    %c0_2 = arith.constant 0 : index
    %1 = vector.load %arg3[%c0_1, %c0_2] : memref<64x32xf32, #tpu.memory_space<vmem>>, vector<64x32xf32>
    %cst = arith.constant dense<0.000000e+00> : vector<16x32xf32>
    %2 = tpu.matmul %0, %1, %cst {dimension_numbers = #tpu.dot_dimension_numbers<[1], [0], [0], [1], [0, 0, 1, 1], [], []>} : vector<16x64xf32>, vector<64x32xf32>, vector<16x32xf32> -> vector<16x32xf32>
    %c0_3 = arith.constant 0 : index
    %c0_4 = arith.constant 0 : index
    %3 = vector.load %arg4[%c0_3, %c0_4] : memref<3x32xf32, #tpu.memory_space<vmem>>, vector<3x32xf32>
    %4 = vector.extract_strided_slice %3 {offsets = [0, 0], sizes = [1, 32], strides = [1, 1]} : vector<3x32xf32> to vector<1x32xf32>
    %5 = vector.extract_strided_slice %3 {offsets = [1, 0], sizes = [1, 32], strides = [1, 1]} : vector<3x32xf32> to vector<1x32xf32>
    %6 = vector.extract_strided_slice %3 {offsets = [2, 0], sizes = [1, 32], strides = [1, 1]} : vector<3x32xf32> to vector<1x32xf32>
    %7 = vector.broadcast %4 : vector<1x32xf32> to vector<16x32xf32>
    %8 = arith.addf %2, %7 : vector<16x32xf32>
    %c0_5 = arith.constant 0 : index
    %c0_6 = arith.constant 0 : index
    %9 = vector.load %arg2[%c0_5, %c0_6] : memref<16x32xf32, #tpu.memory_space<vmem>>, vector<16x32xf32>
    %10 = arith.addf %8, %9 : vector<16x32xf32>
    %cst_7 = arith.constant dense<0.000000e+00> : vector<16xf32>
    %11 = vector.multi_reduction <add>, %10, %cst_7 [1] : vector<16x32xf32> to vector<16xf32>
    %12 = vector.shape_cast %11 : vector<16xf32> to vector<16x1xf32>
    %cst_8 = arith.constant 3.125000e-02 : f32
    %13 = vector.broadcast %cst_8 : f32 to vector<16x1xf32>
    %14 = arith.mulf %12, %13 : vector<16x1xf32>
    %15 = vector.broadcast %14 : vector<16x1xf32> to vector<16x32xf32>
    %16 = arith.subf %10, %15 : vector<16x32xf32>
    %17 = arith.mulf %16, %16 : vector<16x32xf32>
    %cst_9 = arith.constant dense<0.000000e+00> : vector<16xf32>
    %18 = vector.multi_reduction <add>, %17, %cst_9 [1] : vector<16x32xf32> to vector<16xf32>
    %19 = vector.shape_cast %18 : vector<16xf32> to vector<16x1xf32>
    %cst_10 = arith.constant 3.125000e-02 : f32
    %20 = vector.broadcast %cst_10 : f32 to vector<16x1xf32>
    %21 = arith.mulf %19, %20 : vector<16x1xf32>
    %cst_11 = arith.constant 9.99999996E-13 : f32
    %22 = vector.broadcast %cst_11 : f32 to vector<16x1xf32>
    %23 = arith.addf %21, %22 : vector<16x1xf32>
    %24 = math.rsqrt %23 : vector<16x1xf32>
    %25 = vector.broadcast %5 : vector<1x32xf32> to vector<16x32xf32>
    %26 = vector.broadcast %24 : vector<16x1xf32> to vector<16x32xf32>
    %27 = arith.mulf %25, %26 : vector<16x32xf32>
    %28 = arith.mulf %16, %27 : vector<16x32xf32>
    %29 = vector.broadcast %6 : vector<1x32xf32> to vector<16x32xf32>
    %30 = arith.addf %28, %29 : vector<16x32xf32>
    %c0_12 = arith.constant 0 : index
    %c0_13 = arith.constant 0 : index
    %31 = vector.load %arg5[%c0_12, %c0_13] : memref<16x32xf32, #tpu.memory_space<vmem>>, vector<16x32xf32>
    tpu.vector_store %arg5[%c0_12, %c0_13], %30 {strides = array<i32>} : memref<16x32xf32, #tpu.memory_space<vmem>>, vector<16x32xf32>,
    return
  }
  func.func @transform_0(%arg0: i32) -> (i32, i32) {
    %c0_i32 = arith.constant 0 : i32
    %c0_i32_0 = arith.constant 0 : i32
    return %arg0, %c0_i32 : i32, i32
  }
  func.func @transform_1(%arg0: i32) -> (i32, i32) {
    %c0_i32 = arith.constant 0 : i32
    %c0_i32_0 = arith.constant 0 : i32
    return %arg0, %c0_i32 : i32, i32
  }
  func.func @transform_2(%arg0: i32) -> (i32, i32) {
    %c0_i32 = arith.constant 0 : i32
    %c0_i32_0 = arith.constant 0 : i32
    %c0_i32_1 = arith.constant 0 : i32
    return %c0_i32, %c0_i32_0 : i32, i32
  }
  func.func @transform_3(%arg0: i32) -> (i32, i32) {
    %c0_i32 = arith.constant 0 : i32
    %c0_i32_0 = arith.constant 0 : i32
    %c0_i32_1 = arith.constant 0 : i32
    return %c0_i32, %c0_i32_0 : i32, i32
  }
  func.func @transform_4(%arg0: i32) -> (i32, i32) {
    %c0_i32 = arith.constant 0 : i32
    %c0_i32_0 = arith.constant 0 : i32
    return %arg0, %c0_i32 : i32, i32
  }
}

</mosaic_0001>

<bundles_post_ra>
// kernel: tpu_custom_call.1
= control target key start
LH: loop header
LB: loop body
LE: loop exit
PB: predicated region body
PF: predicated region fallthrough
CT: control target
= control target key end

     0   :  { %s259_s0 = inlined_call_operand.vmem [shape: f32[16,64], index: 0, kind: input, shape index: {}]   ;;  %s260_s1 = inlined_call_operand.vmem [shape: f32[16,32], index: 1, kind: input, shape index: {}]   ;;  %s261_s2 = inlined_call_operand.vmem [shape: f32[64,32], index: 2, kind: input, shape index: {}]   ;;  %s262_s3 = inlined_call_operand.vmem [shape: f32[3,32], index: 3, kind: input, shape index: {}]   ;;  %s263_s4 = inlined_call_operand.hbm [shape: f32[16,32], index: 4, kind: output, shape index: {}]  }
   0x1   :  { %v27_v0 = vld [vmem:[%s261_s2 + $0x38] sm:$0xff]  ;;  %v26_v1 = vld [vmem:[%s261_s2 + $0x30] sm:$0xff]  ;;  %v25_v2 = vld [vmem:[%s261_s2 + $0x28] sm:$0xff] }
   0x2   :  { %45 = vmatpush.msra.mxu0 %v27_v0  ;;  %137 = vmatpush.msra.mxu1 %v27_v0 }
   0x4   :  { %46 = vmatpush.msra.mxu0 %v26_v1  ;;  %138 = vmatpush.msra.mxu1 %v26_v1 }
   0x5   :  { %9 = vsyncpa [#allocation3], 0  ;;  %v24_v3 = vld [vmem:[%s261_s2 + $0x20] sm:$0xff]  ;;  %v23_v4 = vld [vmem:[%s261_s2 + $0x18] sm:$0xff]  ;;  %vm30_vm0 = vcmask 523264   ;;  %vm64_vm1 = vcmask 261120  }
   0x6   :  { %47 = vmatpush.msra.mxu0 %v25_v2  ;;  %139 = vmatpush.msra.mxu1 %v25_v2  ;;  %v22_v5 = vld [vmem:[%s261_s2 + $0x10] sm:$0xff]  ;;  %v21_v6 = vld [vmem:[%s261_s2 + $0x8] sm:$0xff]  ;;  %v20_v7 = vld [vmem:[%s261_s2] sm:$0xff]  ;;  %s123_s15 = sshll.u32 %s263_s4, 4  ;;  %s179_s16 = smov 128   ;;  %s124_s15 = int_to_ptr.hbm [resolvable:$true] %s123_s15 }
   0x7   :  { %v18_v8 = vld [vmem:[%s259_s0] sm:$0xff]  ;;  %v19_v9 = vld [vmem:[%s259_s0 + $0x8] sm:$0xff]  ;;  %s180_s17 = smov 8  }
   0x8   :  { %48 = vmatpush.msra.mxu0 %v24_v3  ;;  %140 = vmatpush.msra.mxu1 %v24_v3  ;;  %v239_v10 = vld [vmem:[%s262_s3] sm:$0x7]  ;;  %v61_v18 = vld [vmem:[%s260_s1 + $0x8] sm:$0xff] }
   0x9   :  { %v29_v11 = vperm.slane %v239_v10, 0  ;;  %v60_v13 = vld [vmem:[%s260_s1] sm:$0xff]  ;;  %v107_v44 = vperm.slane %v239_v10, 1  ;;  %v112_v49 = vperm.slane %v239_v10, 2  ;;  %s178_s1 = smov [#allocation2]  }
   0xa   :  { %49 = vmatpush.msra.mxu0 %v23_v4  ;;  %141 = vmatpush.msra.mxu1 %v23_v4  ;;  %s121_s3 = sshll.u32 %s178_s1, 4  ;;  %s122_s3 = int_to_ptr.vmem [resolvable:$true] %s121_s3 }
   0xc   :  { %50 = vmatpush.msra.mxu0 %v22_v5  ;;  %142 = vmatpush.msra.mxu1 %v22_v5 }
   0xe   :  { %51 = vmatpush.msra.mxu0 %v21_v6  ;;  %143 = vmatpush.msra.mxu1 %v21_v6 }
  0x10   :  { %52 = vmatpush.msra.mxu0 %v20_v7  ;;  %144 = vmatpush.msra.mxu1 %v20_v7 }
  0x11   :  { %135 = vmatmul.msk.f32.vlgmr.msra.gmra.mxu0 %vm30_vm0, %v18_v8  ;;  %136 = vmatmul.msk.f32.vlgmr.msra.gmra.mxu1 %vm30_vm0, %v19_v9 }
  0x8e   :  { %v54_v12 = vpop.f32.mrf.mxu0  ;;  %v57_v14 = vpop.f32.mrf.mxu1 }
  0x8f   :  { %v55_v15 = vadd.f32 %v54_v12, %v29_v11  ;;  %v58_v17 = vadd.f32 %v57_v14, %v29_v11 }
  0x91   :  { %v62_v16 = vadd.f32 %v60_v13, %v55_v15  ;;  %v63_v20 = vadd.f32 %v61_v18, %v58_v17 }
  0x93   :  { %v65_v19 = vsel %vm64_vm1, %v62_v16, 0.0  ;;  %v68_v21 = vsel %vm64_vm1, %v63_v20, 0.0 }
  0x94   :  { %66 = vadd.xlane.f32.xlu0 %v65_v19 }
  0x9c   :  { %69 = vadd.xlane.f32.xlu0 %v68_v21 }
 0x107   :  { %v67_v22 = vpop.xlane.xlu0 %66 }
 0x108   :  { %v71_v23 = vmul.f32 0.03125, %v67_v22 }
 0x10a   :  { %v73_v24 = vsub.f32 %v62_v16, %v71_v23 }
 0x10c   :  { %v75_v25 = vmul.f32 %v73_v24, %v73_v24 }
 0x10e   :  { %v77_v26 = vsel %vm64_vm1, %v75_v25, 0.0 }
 0x10f   :  { %78 = vadd.xlane.f32.xlu1 %v77_v26  ;;  %v70_v27 = vpop.xlane.xlu0 %69 }
 0x110   :  { %v72_v28 = vmul.f32 0.03125, %v70_v27 }
 0x112   :  { %v74_v29 = vsub.f32 %v63_v20, %v72_v28 }
 0x114   :  { %v76_v30 = vmul.f32 %v74_v29, %v74_v29 }
 0x116   :  { %v80_v31 = vsel %vm64_vm1, %v76_v30, 0.0 }
 0x117   :  { %81 = vadd.xlane.f32.xlu1 %v80_v31 }
 0x182   :  { %v79_v32 = vpop.xlane.xlu1 %78 }
 0x183   :  { %v83_v33 = vmul.f32 0.03125, %v79_v32 }
 0x185   :  { %v85_v34 = vadd.f32 1e-12, %v83_v33 }
 0x187   :  { %148 = vrsqrt.f32 %v85_v34  ;;  %vm93_vm3 = vweird.f32 %v85_v34 }
 0x18a   :  { %v82_v35 = vpop.xlane.xlu1 %81 }
 0x18b   :  { %v84_v36 = vmul.f32 0.03125, %v82_v35 }
 0x18d   :  { %v149_v37 = vpop.eup %148  ;;  %v86_v38 = vadd.f32 1e-12, %v84_v36 }
 0x18e   :  { %v88_v39 = vmul.f32 %v149_v37, %v85_v34  ;;  %vm94_vm2 = vweird.f32 %v149_v37 }
 0x18f   :  { %150 = vrsqrt.f32 %v86_v38  ;;  %vm95_vm4 = vmor %vm93_vm3, %vm94_vm2  ;;  %vm103_vm6 = vweird.f32 %v86_v38 }
 0x190   :  { %v89_v40 = vmul.f32 %v149_v37, %v88_v39 }
 0x192   :  { %v90_v41 = vmul.f32 0.5, %v89_v40 }
 0x194   :  { %v91_v42 = vsub.f32 1.5, %v90_v41 }
 0x195   :  { %v151_v43 = vpop.eup %150 }
 0x196   :  { %v92_v45 = vmul.f32 %v149_v37, %v91_v42  ;;  %v98_v46 = vmul.f32 %v151_v43, %v86_v38  ;;  %vm104_vm5 = vweird.f32 %v151_v43 }
 0x197   :  { %vm105_vm7 = vmor %vm103_vm6, %vm104_vm5 }
 0x198   :  { %v96_v47 = vsel %vm95_vm4, %v149_v37, %v92_v45  ;;  %v99_v48 = vmul.f32 %v151_v43, %v98_v46 }
 0x199   :  { %v108_v50 = vmul.f32 %v107_v44, %v96_v47 }
 0x19a   :  { %v100_v51 = vmul.f32 0.5, %v99_v48 }
 0x19b   :  { %v110_v52 = vmul.f32 %v108_v50, %v73_v24 }
 0x19c   :  { %v101_v53 = vsub.f32 1.5, %v100_v51 }
 0x19d   :  { %v113_v54 = vadd.f32 %v112_v49, %v110_v52 }
 0x19e   :  { %v102_v55 = vmul.f32 %v151_v43, %v101_v53 }
 0x19f   :  { %115 = vst.msk [vmem:[#allocation2] sm:$0xff] %vm64_vm1, %v113_v54 }
 0x1a0   :  { %v106_v56 = vsel %vm105_vm7, %v151_v43, %v102_v55 }
 0x1a1   :  { %v109_v57 = vmul.f32 %v107_v44, %v106_v56 }
 0x1a3   :  { %v111_v58 = vmul.f32 %v109_v57, %v74_v29 }
 0x1a5   :  { %v114_v59 = vadd.f32 %v112_v49, %v111_v58 }
 0x1a7   :  { %116 = vst.msk [vmem:[#allocation2 + $0x8] sm:$0xff] %vm64_vm1, %v114_v59 }
 0x1a8   :  { %129 = dma.vmem_to_hbm [thread:$0]  %s122_s3, 256, %s124_s15, [#allocation3], %s179_s16, %s179_s16, %s180_s17  }
 0x1a9   :  { %176 = dma.done.wait [#allocation3], 256  }
 0x1aa   :  { %177 = vsyncadd [#allocation3], 4294967040 }
 0x1ab   :  { %134 = vsyncpa [#allocation3], 1 }

</bundles_post_ra>
